<compile_context>
chip_gen: v5e
topology: v5e:2x2
jax: 0.10.0
libtpu: 0.0.40
codegen_flags: <defaults>
</compile_context>

<pallas_src>
import functools

import jax
import jax.numpy as jnp
from jax.experimental import pallas as pl
from jax.experimental.pallas import tpu as pltpu


# ----------------------------------------------------------------------------
# Helpers
# ----------------------------------------------------------------------------
def _round_up(x: int, m: int) -> int:
    return (x + m - 1) // m * m


def _interp_matrix(out_size: int, in_size: int) -> jnp.ndarray:
    """Dense (out_size, in_size) 1-D bilinear interpolation matrix (align_corners=True)."""
    if in_size == 1:
        return jnp.ones((out_size, 1), jnp.float32)
    if out_size == 1:
        return jnp.zeros((1, in_size), jnp.float32).at[0, 0].set(1.0)
    i = jnp.arange(out_size, dtype=jnp.float32)
    src = i * (in_size - 1) / (out_size - 1)
    i0 = jnp.clip(jnp.floor(src).astype(jnp.int32), 0, in_size - 2)
    w1 = src - i0.astype(jnp.float32)
    w0 = 1.0 - w1
    rows = jnp.arange(out_size)
    m = jnp.zeros((out_size, in_size), jnp.float32)
    m = m.at[rows, i0].add(w0)
    m = m.at[rows, i0 + 1].add(w1)
    return m


def _vmem_capacity_bytes() -> int:
    """Generation-aware VMEM capacity; falls back to v7x's 64 MiB if unknown."""
    try:
        info = pltpu.get_tpu_info()
        cap = getattr(info, "vmem_capacity_bytes", None)
        if cap:
            return int(cap)
    except Exception:
        pass
    return 64 << 20


def _plan_seg_tiles(c, hs, ws, h, w, granule, compute_dtype):
    """Pick the row-tile TH and an explicit vmem_limit from the chip's VMEM size."""
    cap = _vmem_capacity_bytes()
    item = jnp.dtype(compute_dtype).itemsize
    w_pad = _round_up(w, 128)
    ws_pad = _round_up(ws, 128)
    hs_sub = _round_up(hs, 8)
    hs_lane = _round_up(hs, 128)
    # TH-independent residents (Pallas double-buffers every blocked input).
    fixed = (2 * _round_up(ws, 8) * w_pad * item       # B^T
             + 2 * c * hs_sub * ws_pad * item          # seg slab
             + c * hs_sub * w_pad * item               # stage-1 scratch (W-upsampled seg)
             + 2 * 2 * 128 * 4)                        # tiny per-image outputs
    # Per-TH-row bytes: A tile + int32 target tile (double buffered), two f32
    # accumulators, and ~4 live f32 planes in the online softmax-CE.
    per_row = (2 * hs_lane * item
               + 2 * w_pad * 4
               + 2 * w_pad * 4
               + 4 * w_pad * 4)
    budget = int(cap * 0.45)
    th = (budget - fixed) // per_row if budget > fixed else granule
    th = max(granule, (int(th) // granule) * granule)
    th = min(th, _round_up(h, granule))
    working = fixed + th * per_row
    vmem_limit = int(min(int(cap * 0.8), max(2 * working + (8 << 20), 32 << 20)))
    return th, vmem_limit


# ----------------------------------------------------------------------------
# Fused bilinear-upsample + pixel cross-entropy (ignore_index) kernel.
#   grid = (N, H_tiles), dimension_semantics = ("parallel", "arbitrary").
#   j == 0 : W-direction upsample of the whole seg slab (one tall matmul) -> scratch.
#   each j : per-class H-direction upsample (TH, hs)@(hs, W) + online softmax CE,
#            accumulated into VMEM loss/count scratches.
#   j == last : reduce accumulators, write one (1, 128) partial per image.
# ----------------------------------------------------------------------------
def _make_fused_seg_ce_kernel(num_classes: int, hs: int, ignore_label: int):
    def kernel(a_ref, bt_ref, seg_ref, tgt_ref, loss_ref, cnt_ref,
               tmp2_ref, loss_acc, cnt_acc):
        j = pl.program_id(1)

        @pl.when(j == 0)
        def _():
            # One tall, lane-dense matmul: (C*hs, ws) @ (ws, W) -> (C*hs, W).
            tmp2_ref[...] = jnp.dot(
                seg_ref[0], bt_ref[...],
                preferred_element_type=jnp.float32).astype(tmp2_ref.dtype)
            loss_acc[...] = jnp.zeros_like(loss_acc)
            cnt_acc[...] = jnp.zeros_like(cnt_acc)

        a = a_ref[...]        # (TH, hs) compute dtype
        tgt = tgt_ref[0]      # (TH, W)  int32, lane-dense

        # Online softmax-CE over classes: only ~3 live (TH, W) f32 planes.
        m = None
        sum_exp = None
        tgt_logit = None
        for ci in range(num_classes):
            t2 = tmp2_ref[pl.ds(ci * hs, hs), :]                     # (hs, W), sublane slice
            p = jnp.dot(a, t2, preferred_element_type=jnp.float32)   # (TH, W) f32
            # NOTE(intentional): a non-ignore target >= num_classes contributes
            # tgt_logit == 0 (loss == lse); PyTorch's NLLLoss would raise instead.
            sel = tgt == ci
            if ci == 0:
                m = p
                sum_exp = jnp.ones_like(p)
                tgt_logit = jnp.where(sel, p, 0.0)
            else:
                m_new = jnp.maximum(m, p)
                sum_exp = sum_exp * jnp.exp(m - m_new) + jnp.exp(p - m_new)
                tgt_logit = tgt_logit + jnp.where(sel, p, 0.0)
                m = m_new

        lse = m + jnp.log(sum_exp)
        valid = tgt != ignore_label
        loss_acc[...] += jnp.where(valid, lse - tgt_logit, 0.0)
        cnt_acc[...] += valid.astype(jnp.float32)

        @pl.when(j == pl.num_programs(1) - 1)
        def _():
            loss_ref[0] = jnp.broadcast_to(
                jnp.sum(loss_acc[...], keepdims=True), (1, 128))
            cnt_ref[0] = jnp.broadcast_to(
                jnp.sum(cnt_acc[...], keepdims=True), (1, 128))

    return kernel


def fused_seg_ce_pallas(seg, target, ignore_label, compute_dtype=jnp.float32,
                        tile_h_cap=None):
    """seg: (N, C, hs, ws), target: (N, H, W) int -> (loss_sum, valid_count).
    Bilinear upsample (align_corners=True) + CE fused; upsampled pred never hits HBM."""
    n, c, hs, ws = seg.shape
    _, h, w = target.shape

    granule = 16 if jnp.dtype(compute_dtype).itemsize < 4 else 8  # bf16 sublane packing
    th, vmem_limit = _plan_seg_tiles(c, hs, ws, h, w, granule, compute_dtype)
    if tile_h_cap is not None:
        th = min(th, max(granule, (int(tile_h_cap) // granule) * granule))
    h_pad = _round_up(h, th)
    n_ht = h_pad // th

    a = _interp_matrix(h, hs)                 # (H, hs)    H-direction weights
    bt = _interp_matrix(w, ws).T              # (ws, W)    W-direction weights (transposed)
    tgt = target.astype(jnp.int32)
    if h_pad != h:
        # Padded rows: zero interp rows + ignore_label targets -> masked out.
        a = jnp.pad(a, ((0, h_pad - h), (0, 0)))
        tgt = jnp.pad(tgt, ((0, 0), (0, h_pad - h), (0, 0)),
                      constant_values=ignore_label)
    a = a.astype(compute_dtype)
    bt = bt.astype(compute_dtype)
    # (N, C, hs, ws) -> (N, C*hs, ws): pure reshape, feeds the tall stage-1 matmul.
    seg_flat = seg.reshape(n, c * hs, ws).astype(compute_dtype)

    itemsize = jnp.dtype(compute_dtype).itemsize
    flops = int(n * 2 * c * hs * ws * w                       # stage 1, once per image
                + n * n_ht * 2 * c * th * hs * w              # stage 2 per tile
                + n * h_pad * w * (6 * c + 6))                # online CE elementwise
    transcendentals = int(n * h_pad * w * (2 * c + 1))
    bytes_accessed = int(h_pad * hs * itemsize + ws * w * itemsize
                         + n * c * hs * ws * itemsize         # seg slab read once per image
                         + n * h_pad * w * 4                  # targets
                         + 2 * n * 128 * 4)                   # per-image partial outputs

    loss_part, cnt_part = pl.pallas_call(
        _make_fused_seg_ce_kernel(c, hs, ignore_label),
        out_shape=(
            jax.ShapeDtypeStruct((n, 1, 128), jnp.float32),
            jax.ShapeDtypeStruct((n, 1, 128), jnp.float32),
        ),
        grid=(n, n_ht),
        in_specs=[
            pl.BlockSpec((th, hs), lambda i, j: (j, 0)),               # A row tile
            pl.BlockSpec((ws, w), lambda i, j: (0, 0)),                # B^T (resident)
            pl.BlockSpec((1, c * hs, ws), lambda i, j: (i, 0, 0)),     # seg slab (per image)
            pl.BlockSpec((1, th, w), lambda i, j: (i, j, 0)),          # target tile
        ],
        out_specs=(
            pl.BlockSpec((1, 1, 128), lambda i, j: (i, 0, 0)),
            pl.BlockSpec((1, 1, 128), lambda i, j: (i, 0, 0)),
        ),
        scratch_shapes=[
            pltpu.VMEM((c * hs, w), compute_dtype),   # stage-1 result (W-upsampled seg)
            pltpu.VMEM((th, w), jnp.float32),         # loss accumulator
            pltpu.VMEM((th, w), jnp.float32),         # valid-count accumulator
        ],
        compiler_params=pltpu.CompilerParams(
            dimension_semantics=("parallel", "arbitrary"),
            vmem_limit_bytes=vmem_limit),
        cost_estimate=pl.CostEstimate(
            flops=flops, transcendentals=transcendentals,
            bytes_accessed=bytes_accessed),
    )(a, bt, seg_flat, tgt)

    loss_sum = jnp.sum(loss_part[:, 0, 0])
    valid_cnt = jnp.sum(cnt_part[:, 0, 0])
    return loss_sum, valid_cnt


# ----------------------------------------------------------------------------
# Contrast losses (PPL_a cross-entropy + PPL_b squared distance), tiled over M.
# ----------------------------------------------------------------------------
def _make_contrast_kernel(ignore_label: int):
    def kernel(logits_ref, tgt_ref, ce_ref, ppd_ref, cnt_ref):
        logits = logits_ref[...]                       # (TM, K) f32
        tgt = tgt_ref[...]                             # (TM, 1) i32
        m = jnp.max(logits, axis=-1, keepdims=True)
        lse = m + jnp.log(jnp.sum(jnp.exp(logits - m), axis=-1, keepdims=True))
        cls = jax.lax.broadcasted_iota(jnp.int32, logits.shape, 1)
        tgt_logit = jnp.sum(jnp.where(cls == tgt, logits, 0.0), axis=-1, keepdims=True)
        valid = tgt != ignore_label
        ce = jnp.where(valid, lse - tgt_logit, 0.0)
        ppd = jnp.where(valid, (1.0 - tgt_logit) ** 2, 0.0)
        ce_ref[0] = jnp.broadcast_to(jnp.sum(ce, keepdims=True), (1, 128))
        ppd_ref[0] = jnp.broadcast_to(jnp.sum(ppd, keepdims=True), (1, 128))
        cnt_ref[0] = jnp.broadcast_to(
            jnp.sum(valid.astype(jnp.float32), keepdims=True), (1, 128))

    return kernel


def _plan_contrast_tile(m: int, k: int) -> int:
    """M-tile sized so double-buffered logits+targets stay within a few MiB of VMEM."""
    k_pad = _round_up(k, 128)
    per_row = 2 * k_pad * 4 + 2 * 128 * 4
    tm = max(8, min(1024, ((8 << 20) // per_row) // 8 * 8))
    return min(tm, _round_up(m, 8))


def contrast_losses_pallas(contrast_logits, contrast_target, ignore_label, tile_m=None):
    """contrast_logits: (M, K), contrast_target: (M,) -> (ce_sum, ppd_sum, valid_count)."""
    m, k = contrast_logits.shape
    tm = int(tile_m) if tile_m is not None else _plan_contrast_tile(m, k)
    tm = max(8, (tm // 8) * 8)
    m_pad = _round_up(m, tm)
    n_mt = m_pad // tm

    logits = contrast_logits.astype(jnp.float32)
    tgt = contrast_target.astype(jnp.int32)
    if m_pad != m:
        logits = jnp.pad(logits, ((0, m_pad - m), (0, 0)))
        tgt = jnp.pad(tgt, ((0, m_pad - m),), constant_values=ignore_label)
    tgt2d = tgt[:, None]                                    # (M_pad, 1)

    ce_p, ppd_p, cnt_p = pl.pallas_call(
        _make_contrast_kernel(ignore_label),
        out_shape=(
            jax.ShapeDtypeStruct((n_mt, 1, 128), jnp.float32),
            jax.ShapeDtypeStruct((n_mt, 1, 128), jnp.float32),
            jax.ShapeDtypeStruct((n_mt, 1, 128), jnp.float32),
        ),
        grid=(n_mt,),
        in_specs=[
            pl.BlockSpec((tm, k), lambda i: (i, 0)),
            pl.BlockSpec((tm, 1), lambda i: (i, 0)),
        ],
        out_specs=(
            pl.BlockSpec((1, 1, 128), lambda i: (i, 0, 0)),
            pl.BlockSpec((1, 1, 128), lambda i: (i, 0, 0)),
            pl.BlockSpec((1, 1, 128), lambda i: (i, 0, 0)),
        ),
        compiler_params=pltpu.CompilerParams(
            dimension_semantics=("parallel",)),
        cost_estimate=pl.CostEstimate(
            flops=8 * m_pad * k, transcendentals=m_pad * k,
            bytes_accessed=4 * m_pad * k + 4 * m_pad + 3 * n_mt * 128 * 4),
    )(logits, tgt2d)

    return (jnp.sum(ce_p[:, 0, 0]), jnp.sum(ppd_p[:, 0, 0]), jnp.sum(cnt_p[:, 0, 0]))


# ----------------------------------------------------------------------------
# Full PixelPrototypeCELoss forward (dict branch).
# ----------------------------------------------------------------------------
def pixel_prototype_ce_loss(seg, target, contrast_logits, contrast_target,
                            loss_ppl_a_weight=0.01, loss_ppl_b_weight=0.001,
                            ignore_label=-1, compute_dtype=jnp.float32,
                            seg_tile_h=None, contrast_tile_m=None):
    # Fused: F.interpolate(seg, (h,w), bilinear, align_corners=True) + FSCELoss.
    loss_sum, valid_cnt = fused_seg_ce_pallas(
        seg, target, ignore_label, compute_dtype, tile_h_cap=seg_tile_h)
    seg_loss = loss_sum / jnp.maximum(valid_cnt, 1.0)

    # PPL_a + PPL_b, M-tiled.
    ce_sum, ppd_sum, cnt = contrast_losses_pallas(
        contrast_logits, contrast_target, ignore_label, tile_m=contrast_tile_m)
    denom = jnp.maximum(cnt, 1.0)
    loss_ppc = ce_sum / denom
    loss_ppd = ppd_sum / denom

    return seg_loss + loss_ppl_a_weight * loss_ppc + loss_ppl_b_weight * loss_ppd


# ----------------------------------------------------------------------------
# Pure-JAX reference (same math, no Pallas) for a correctness check.
# ----------------------------------------------------------------------------
def _reference_loss(seg, target, contrast_logits, contrast_target, wa, wb, ignore_label):
    n, c, hs, ws = seg.shape
    h, w = target.shape[1], target.shape[2]
    a = _interp_matrix(h, hs)
    b = _interp_matrix(w, ws)
    pred = jnp.einsum('Hh,nchw,Ww->ncHW', a, seg.astype(jnp.float32), b)

    logp = jax.nn.log_softmax(pred, axis=1)
    t = target.astype(jnp.int32)
    valid = t != ignore_label
    tc = jnp.clip(t, 0, c - 1)
    nll = -jnp.take_along_axis(logp, tc[:, None, :, :], axis=1)[:, 0]
    seg_loss = jnp.sum(jnp.where(valid, nll, 0.0)) / jnp.maximum(jnp.sum(valid), 1)

    ct = contrast_target.astype(jnp.int32)
    cvalid = ct != ignore_label
    clogp = jax.nn.log_softmax(contrast_logits.astype(jnp.float32), axis=1)
    ctc = jnp.clip(ct, 0, contrast_logits.shape[1] - 1)
    gathered = jnp.take_along_axis(contrast_logits.astype(jnp.float32), ctc[:, None], axis=1)[:, 0]
    cnll = -jnp.take_along_axis(clogp, ctc[:, None], axis=1)[:, 0]
    cnt = jnp.maximum(jnp.sum(cvalid), 1)
    loss_ppc = jnp.sum(jnp.where(cvalid, cnll, 0.0)) / cnt
    loss_ppd = jnp.sum(jnp.where(cvalid, (1.0 - gathered) ** 2, 0.0)) / cnt
    return seg_loss + wa * loss_ppc + wb * loss_ppd


if __name__ == "__main__":
    key = jax.random.PRNGKey(0)
    k1, k2, k3, k4 = jax.random.split(key, 4)

    # Small shapes consistent with the module: seg logits at low resolution,
    # target at full resolution, contrast logits over (classes * prototypes).
    N, NUM_CLASSES, HS, WS = 2, 4, 8, 8
    H, W = 16, 16
    NUM_PROTOTYPES = 4
    K = NUM_CLASSES * NUM_PROTOTYPES
    M = 128  # number of contrast samples

    seg = jax.random.normal(k1, (N, NUM_CLASSES, HS, WS), dtype=jnp.float32)
    target = jax.random.randint(k2, (N, H, W), -1, NUM_CLASSES).astype(jnp.int32)
    contrast_logits = jax.random.normal(k3, (M, K), dtype=jnp.float32)
    contrast_target = jax.random.randint(k4, (M,), -1, K).astype(jnp.float32)  # float + .long() like PyTorch

    wa, wb, ignore = 0.01, 0.001, -1

    # compute_dtype=jnp.bfloat16 is recommended on v6e/v7x for the resize matmuls;
    # f32 here for exact parity with the f32 reference.  seg_tile_h / contrast_tile_m
    # caps force multiple grid steps so the accumulate/finalize paths are exercised.
    loss_fn = jax.jit(functools.partial(
        pixel_prototype_ce_loss,
        loss_ppl_a_weight=wa, loss_ppl_b_weight=wb, ignore_label=ignore,
        compute_dtype=jnp.float32, seg_tile_h=8, contrast_tile_m=64))
    loss = jax.block_until_ready(loss_fn(seg, target, contrast_logits, contrast_target))

    ref = jax.block_until_ready(
        _reference_loss(seg, target, contrast_logits, contrast_target, wa, wb, ignore))

    assert jnp.isfinite(loss), "loss is not finite"
    assert abs(float(loss) - float(ref)) < 1e-3, f"mismatch: pallas={float(loss)} ref={float(ref)}"

    print("KERNEL_OK")
</pallas_src>

<mosaic_0001>
module attributes {stable_mosaic.version = 11 : i64} {
  func.func @kernel(%arg0: i32, %arg1: i32, %arg2: memref<8x8xf32, #tpu.memory_space<vmem>>, %arg3: memref<8x16xf32, #tpu.memory_space<vmem>>, %arg4: memref<1x32x8xf32, #tpu.memory_space<vmem>>, %arg5: memref<1x8x16xi32, #tpu.memory_space<vmem>>, %arg6: memref<1x1x128xf32, #tpu.memory_space<vmem>>, %arg7: memref<1x1x128xf32, #tpu.memory_space<vmem>>, %arg8: memref<32x16xf32, #tpu.memory_space<vmem>>, %arg9: memref<8x16xf32, #tpu.memory_space<vmem>>, %arg10: memref<8x16xf32, #tpu.memory_space<vmem>>) attributes {dimension_semantics = [#tpu.dimension_semantics<parallel>, #tpu.dimension_semantics<arbitrary>], iteration_bounds = array<i64: 2, 2>, scalar_prefetch = 0 : i64, scratch_operands = 3 : i64, tpu.core_type = #tpu.core_type<tc>, window_params = [{transform_indices = @transform_0, window_bounds = array<i64: 8, 8>}, {pipeline_mode = #tpu.pipeline_mode<synchronous>, transform_indices = @transform_1, window_bounds = array<i64: 8, 16>}, {transform_indices = @transform_2, window_bounds = array<i64: 1, 32, 8>}, {transform_indices = @transform_3, window_bounds = array<i64: 1, 8, 16>}, {transform_indices = @transform_4, window_bounds = array<i64: 1, 1, 128>}, {transform_indices = @transform_5, window_bounds = array<i64: 1, 1, 128>}]} {
    %c0_i32 = arith.constant 0 : i32
    %0 = arith.cmpi eq, %arg1, %c0_i32 : i32
    %1 = arith.extui %0 : i1 to i32
    %c0_i32_0 = arith.constant 0 : i32
    %2 = arith.cmpi ne, %1, %c0_i32_0 : i32
    scf.if %2 {
      %c0_30 = arith.constant 0 : index
      %c0_31 = arith.constant 0 : index
      %c0_32 = arith.constant 0 : index
      %73 = vector.load %arg4[%c0_30, %c0_31, %c0_32] : memref<1x32x8xf32, #tpu.memory_space<vmem>>, vector<1x32x8xf32>
      %74 = vector.shape_cast %73 : vector<1x32x8xf32> to vector<32x8xf32>
      %c0_33 = arith.constant 0 : index
      %c0_34 = arith.constant 0 : index
      %75 = vector.load %arg3[%c0_33, %c0_34] : memref<8x16xf32, #tpu.memory_space<vmem>>, vector<8x16xf32>
      %cst_35 = arith.constant dense<0.000000e+00> : vector<32x16xf32>
      %76 = tpu.matmul %74, %75, %cst_35 {dimension_numbers = #tpu.dot_dimension_numbers<[1], [0], [0], [1], [0, 0, 1, 1], [], []>} : vector<32x8xf32>, vector<8x16xf32>, vector<32x16xf32> -> vector<32x16xf32>
      %c0_36 = arith.constant 0 : index
      %c0_37 = arith.constant 0 : index
      %77 = vector.load %arg8[%c0_36, %c0_37] : memref<32x16xf32, #tpu.memory_space<vmem>>, vector<32x16xf32>
      tpu.vector_store %arg8[%c0_36, %c0_37], %76 {strides = array<i32>} : memref<32x16xf32, #tpu.memory_space<vmem>>, vector<32x16xf32>,
      %cst_38 = arith.constant 0.000000e+00 : f32
      %78 = vector.broadcast %cst_38 : f32 to vector<8x16xf32>
      %c0_39 = arith.constant 0 : index
      %c0_40 = arith.constant 0 : index
      %79 = vector.load %arg9[%c0_39, %c0_40] : memref<8x16xf32, #tpu.memory_space<vmem>>, vector<8x16xf32>
      tpu.vector_store %arg9[%c0_39, %c0_40], %78 {strides = array<i32>} : memref<8x16xf32, #tpu.memory_space<vmem>>, vector<8x16xf32>,
      %cst_41 = arith.constant 0.000000e+00 : f32
      %80 = vector.broadcast %cst_41 : f32 to vector<8x16xf32>
      %c0_42 = arith.constant 0 : index
      %c0_43 = arith.constant 0 : index
      %81 = vector.load %arg10[%c0_42, %c0_43] : memref<8x16xf32, #tpu.memory_space<vmem>>, vector<8x16xf32>
      tpu.vector_store %arg10[%c0_42, %c0_43], %80 {strides = array<i32>} : memref<8x16xf32, #tpu.memory_space<vmem>>, vector<8x16xf32>,
    } else {
    }
    %c0 = arith.constant 0 : index
    %c0_1 = arith.constant 0 : index
    %3 = vector.load %arg2[%c0, %c0_1] : memref<8x8xf32, #tpu.memory_space<vmem>>, vector<8x8xf32>
    %c0_2 = arith.constant 0 : index
    %c0_3 = arith.constant 0 : index
    %c0_4 = arith.constant 0 : index
    %4 = vector.load %arg5[%c0_2, %c0_3, %c0_4] : memref<1x8x16xi32, #tpu.memory_space<vmem>>, vector<1x8x16xi32>
    %5 = vector.shape_cast %4 : vector<1x8x16xi32> to vector<8x16xi32>
    %c0_5 = arith.constant 0 : index
    %c0_6 = arith.constant 0 : index
    %6 = vector.load %arg8[%c0_5, %c0_6] : memref<32x16xf32, #tpu.memory_space<vmem>>, vector<8x16xf32>
    %cst = arith.constant dense<0.000000e+00> : vector<8x16xf32>
    %7 = tpu.matmul %3, %6, %cst {dimension_numbers = #tpu.dot_dimension_numbers<[1], [0], [0], [1], [0, 0, 1, 1], [], []>} : vector<8x8xf32>, vector<8x16xf32>, vector<8x16xf32> -> vector<8x16xf32>
    %c0_i32_7 = arith.constant 0 : i32
    %8 = vector.broadcast %c0_i32_7 : i32 to vector<8x16xi32>
    %9 = arith.cmpi eq, %5, %8 : vector<8x16xi32>
    %cst_8 = arith.constant 1.000000e+00 : f32
    %10 = vector.broadcast %cst_8 : f32 to vector<8x16xf32>
    %cst_9 = arith.constant 0.000000e+00 : f32
    %11 = vector.broadcast %cst_9 : f32 to vector<8x16xf32>
    %12 = arith.select %9, %7, %11 : vector<8x16xi1>, vector<8x16xf32>
    %c8 = arith.constant 8 : index
    %c0_10 = arith.constant 0 : index
    %13 = vector.load %arg8[%c8, %c0_10] : memref<32x16xf32, #tpu.memory_space<vmem>>, vector<8x16xf32>
    %cst_11 = arith.constant dense<0.000000e+00> : vector<8x16xf32>
    %14 = tpu.matmul %3, %13, %cst_11 {dimension_numbers = #tpu.dot_dimension_numbers<[1], [0], [0], [1], [0, 0, 1, 1], [], []>} : vector<8x8xf32>, vector<8x16xf32>, vector<8x16xf32> -> vector<8x16xf32>
    %c1_i32 = arith.constant 1 : i32
    %15 = vector.broadcast %c1_i32 : i32 to vector<8x16xi32>
    %16 = arith.cmpi eq, %5, %15 : vector<8x16xi32>
    %17 = arith.maximumf %7, %14 : vector<8x16xf32>
    %18 = arith.subf %7, %17 : vector<8x16xf32>
    %19 = math.exp %18 : vector<8x16xf32>
    %20 = arith.mulf %10, %19 : vector<8x16xf32>
    %21 = arith.subf %14, %17 : vector<8x16xf32>
    %22 = math.exp %21 : vector<8x16xf32>
    %23 = arith.addf %20, %22 : vector<8x16xf32>
    %cst_12 = arith.constant 0.000000e+00 : f32
    %24 = vector.broadcast %cst_12 : f32 to vector<8x16xf32>
    %25 = arith.select %16, %14, %24 : vector<8x16xi1>, vector<8x16xf32>
    %26 = arith.addf %12, %25 : vector<8x16xf32>
    %c16 = arith.constant 16 : index
    %c0_13 = arith.constant 0 : index
    %27 = vector.load %arg8[%c16, %c0_13] : memref<32x16xf32, #tpu.memory_space<vmem>>, vector<8x16xf32>
    %cst_14 = arith.constant dense<0.000000e+00> : vector<8x16xf32>
    %28 = tpu.matmul %3, %27, %cst_14 {dimension_numbers = #tpu.dot_dimension_numbers<[1], [0], [0], [1], [0, 0, 1, 1], [], []>} : vector<8x8xf32>, vector<8x16xf32>, vector<8x16xf32> -> vector<8x16xf32>
    %c2_i32 = arith.constant 2 : i32
    %29 = vector.broadcast %c2_i32 : i32 to vector<8x16xi32>
    %30 = arith.cmpi eq, %5, %29 : vector<8x16xi32>
    %31 = arith.maximumf %17, %28 : vector<8x16xf32>
    %32 = arith.subf %17, %31 : vector<8x16xf32>
    %33 = math.exp %32 : vector<8x16xf32>
    %34 = arith.mulf %23, %33 : vector<8x16xf32>
    %35 = arith.subf %28, %31 : vector<8x16xf32>
    %36 = math.exp %35 : vector<8x16xf32>
    %37 = arith.addf %34, %36 : vector<8x16xf32>
    %cst_15 = arith.constant 0.000000e+00 : f32
    %38 = vector.broadcast %cst_15 : f32 to vector<8x16xf32>
    %39 = arith.select %30, %28, %38 : vector<8x16xi1>, vector<8x16xf32>
    %40 = arith.addf %26, %39 : vector<8x16xf32>
    %c24 = arith.constant 24 : index
    %c0_16 = arith.constant 0 : index
    %41 = vector.load %arg8[%c24, %c0_16] : memref<32x16xf32, #tpu.memory_space<vmem>>, vector<8x16xf32>
    %cst_17 = arith.constant dense<0.000000e+00> : vector<8x16xf32>
    %42 = tpu.matmul %3, %41, %cst_17 {dimension_numbers = #tpu.dot_dimension_numbers<[1], [0], [0], [1], [0, 0, 1, 1], [], []>} : vector<8x8xf32>, vector<8x16xf32>, vector<8x16xf32> -> vector<8x16xf32>
    %c3_i32 = arith.constant 3 : i32
    %43 = vector.broadcast %c3_i32 : i32 to vector<8x16xi32>
    %44 = arith.cmpi eq, %5, %43 : vector<8x16xi32>
    %45 = arith.maximumf %31, %42 : vector<8x16xf32>
    %46 = arith.subf %31, %45 : vector<8x16xf32>
    %47 = math.exp %46 : vector<8x16xf32>
    %48 = arith.mulf %37, %47 : vector<8x16xf32>
    %49 = arith.subf %42, %45 : vector<8x16xf32>
    %50 = math.exp %49 : vector<8x16xf32>
    %51 = arith.addf %48, %50 : vector<8x16xf32>
    %cst_18 = arith.constant 0.000000e+00 : f32
    %52 = vector.broadcast %cst_18 : f32 to vector<8x16xf32>
    %53 = arith.select %44, %42, %52 : vector<8x16xi1>, vector<8x16xf32>
    %54 = arith.addf %40, %53 : vector<8x16xf32>
    %55 = math.log %51 : vector<8x16xf32>
    %56 = arith.addf %45, %55 : vector<8x16xf32>
    %c-1_i32 = arith.constant -1 : i32
    %57 = vector.broadcast %c-1_i32 : i32 to vector<8x16xi32>
    %58 = arith.cmpi ne, %5, %57 : vector<8x16xi32>
    %c0_19 = arith.constant 0 : index
    %c0_20 = arith.constant 0 : index
    %59 = vector.load %arg9[%c0_19, %c0_20] : memref<8x16xf32, #tpu.memory_space<vmem>>, vector<8x16xf32>
    %60 = arith.subf %56, %54 : vector<8x16xf32>
    %cst_21 = arith.constant 0.000000e+00 : f32
    %61 = vector.broadcast %cst_21 : f32 to vector<8x16xf32>
    %62 = arith.select %58, %60, %61 : vector<8x16xi1>, vector<8x16xf32>
    %63 = arith.addf %59, %62 : vector<8x16xf32>
    %c0_22 = arith.constant 0 : index
    %c0_23 = arith.constant 0 : index
    %64 = vector.load %arg9[%c0_22, %c0_23] : memref<8x16xf32, #tpu.memory_space<vmem>>, vector<8x16xf32>
    tpu.vector_store %arg9[%c0_22, %c0_23], %63 {strides = array<i32>} : memref<8x16xf32, #tpu.memory_space<vmem>>, vector<8x16xf32>,
    %c0_24 = arith.constant 0 : index
    %c0_25 = arith.constant 0 : index
    %65 = vector.load %arg10[%c0_24, %c0_25] : memref<8x16xf32, #tpu.memory_space<vmem>>, vector<8x16xf32>
    %66 = arith.extui %58 : vector<8x16xi1> to vector<8x16xi32>
    %67 = arith.sitofp %66 : vector<8x16xi32> to vector<8x16xf32>
    %68 = arith.addf %65, %67 : vector<8x16xf32>
    %c0_26 = arith.constant 0 : index
    %c0_27 = arith.constant 0 : index
    %69 = vector.load %arg10[%c0_26, %c0_27] : memref<8x16xf32, #tpu.memory_space<vmem>>, vector<8x16xf32>
    tpu.vector_store %arg10[%c0_26, %c0_27], %68 {strides = array<i32>} : memref<8x16xf32, #tpu.memory_space<vmem>>, vector<8x16xf32>,
    %c1_i32_28 = arith.constant 1 : i32
    %70 = arith.cmpi eq, %arg1, %c1_i32_28 : i32
    %71 = arith.extui %70 : i1 to i32
    %c0_i32_29 = arith.constant 0 : i32
    %72 = arith.cmpi ne, %71, %c0_i32_29 : i32
    scf.if %72 {
      %c0_30 = arith.constant 0 : index
      %c0_31 = arith.constant 0 : index
      %73 = vector.load %arg9[%c0_30, %c0_31] : memref<8x16xf32, #tpu.memory_space<vmem>>, vector<8x16xf32>
      %74 = vector.shape_cast %73 : vector<8x16xf32> to vector<1x8x16xf32>
      %cst_32 = arith.constant dense<0.000000e+00> : vector<1xf32>
      %75 = vector.multi_reduction <add>, %74, %cst_32 [1, 2] : vector<1x8x16xf32> to vector<1xf32>
      %76 = vector.shape_cast %75 : vector<1xf32> to vector<1x1x1xf32>
      %77 = vector.extract %76[0, 0, 0] : f32 from vector<1x1x1xf32>
      %78 = vector.broadcast %77 : f32 to vector<1x1xf32>
      %79 = vector.shape_cast %78 : vector<1x1xf32> to vector<1x1xf32>
      %80 = vector.broadcast %79 : vector<1x1xf32> to vector<1x128xf32>
      %c0_33 = arith.constant 0 : index
      %c0_34 = arith.constant 0 : index
      %c0_35 = arith.constant 0 : index
      %81 = vector.load %arg6[%c0_33, %c0_34, %c0_35] : memref<1x1x128xf32, #tpu.memory_space<vmem>>, vector<1x1x128xf32>
      %82 = vector.shape_cast %81 : vector<1x1x128xf32> to vector<1x128xf32>
      %83 = vector.shape_cast %80 : vector<1x128xf32> to vector<1x1x128xf32>
      tpu.vector_store %arg6[%c0_33, %c0_34, %c0_35], %83 {strides = array<i32>} : memref<1x1x128xf32, #tpu.memory_space<vmem>>, vector<1x1x128xf32>,
      %c0_36 = arith.constant 0 : index
      %c0_37 = arith.constant 0 : index
      %84 = vector.load %arg10[%c0_36, %c0_37] : memref<8x16xf32, #tpu.memory_space<vmem>>, vector<8x16xf32>
      %85 = vector.shape_cast %84 : vector<8x16xf32> to vector<1x8x16xf32>
      %cst_38 = arith.constant dense<0.000000e+00> : vector<1xf32>
      %86 = vector.multi_reduction <add>, %85, %cst_38 [1, 2] : vector<1x8x16xf32> to vector<1xf32>
      %87 = vector.shape_cast %86 : vector<1xf32> to vector<1x1x1xf32>
      %88 = vector.extract %87[0, 0, 0] : f32 from vector<1x1x1xf32>
      %89 = vector.broadcast %88 : f32 to vector<1x1xf32>
      %90 = vector.shape_cast %89 : vector<1x1xf32> to vector<1x1xf32>
      %91 = vector.broadcast %90 : vector<1x1xf32> to vector<1x128xf32>
      %c0_39 = arith.constant 0 : index
      %c0_40 = arith.constant 0 : index
      %c0_41 = arith.constant 0 : index
      %92 = vector.load %arg7[%c0_39, %c0_40, %c0_41] : memref<1x1x128xf32, #tpu.memory_space<vmem>>, vector<1x1x128xf32>
      %93 = vector.shape_cast %92 : vector<1x1x128xf32> to vector<1x128xf32>
      %94 = vector.shape_cast %91 : vector<1x128xf32> to vector<1x1x128xf32>
      tpu.vector_store %arg7[%c0_39, %c0_40, %c0_41], %94 {strides = array<i32>} : memref<1x1x128xf32, #tpu.memory_space<vmem>>, vector<1x1x128xf32>,
    } else {
    }
    return
  }
  func.func @transform_0(%arg0: i32, %arg1: i32) -> (i32, i32) {
    %c0_i32 = arith.constant 0 : i32
    %c0_i32_0 = arith.constant 0 : i32
    return %arg1, %c0_i32 : i32, i32
  }
  func.func @transform_1(%arg0: i32, %arg1: i32) -> (i32, i32) {
    %c0_i32 = arith.constant 0 : i32
    %c0_i32_0 = arith.constant 0 : i32
    %c0_i32_1 = arith.constant 0 : i32
    return %c0_i32, %c0_i32_0 : i32, i32
  }
  func.func @transform_2(%arg0: i32, %arg1: i32) -> (i32, i32, i32) {
    %c0_i32 = arith.constant 0 : i32
    %c0_i32_0 = arith.constant 0 : i32
    %c0_i32_1 = arith.constant 0 : i32
    return %arg0, %c0_i32, %c0_i32_0 : i32, i32, i32
  }
  func.func @transform_3(%arg0: i32, %arg1: i32) -> (i32, i32, i32) {
    %c0_i32 = arith.constant 0 : i32
    %c0_i32_0 = arith.constant 0 : i32
    return %arg0, %arg1, %c0_i32 : i32, i32, i32
  }
  func.func @transform_4(%arg0: i32, %arg1: i32) -> (i32, i32, i32) {
    %c0_i32 = arith.constant 0 : i32
    %c0_i32_0 = arith.constant 0 : i32
    %c0_i32_1 = arith.constant 0 : i32
    return %arg0, %c0_i32, %c0_i32_0 : i32, i32, i32
  }
  func.func @transform_5(%arg0: i32, %arg1: i32) -> (i32, i32, i32) {
    %c0_i32 = arith.constant 0 : i32
    %c0_i32_0 = arith.constant 0 : i32
    %c0_i32_1 = arith.constant 0 : i32
    return %arg0, %c0_i32, %c0_i32_0 : i32, i32, i32
  }
}

module attributes {stable_mosaic.version = 11 : i64} {
  func.func @kernel(%arg0: i32, %arg1: memref<64x16xf32, #tpu.memory_space<vmem>>, %arg2: memref<64x1xi32, #tpu.memory_space<vmem>>, %arg3: memref<1x1x128xf32, #tpu.memory_space<vmem>>, %arg4: memref<1x1x128xf32, #tpu.memory_space<vmem>>, %arg5: memref<1x1x128xf32, #tpu.memory_space<vmem>>) attributes {dimension_semantics = [#tpu.dimension_semantics<parallel>], iteration_bounds = array<i64: 2>, scalar_prefetch = 0 : i64, scratch_operands = 0 : i64, tpu.core_type = #tpu.core_type<tc>, window_params = [{transform_indices = @transform_0, window_bounds = array<i64: 64, 16>}, {transform_indices = @transform_1, window_bounds = array<i64: 64, 1>}, {transform_indices = @transform_2, window_bounds = array<i64: 1, 1, 128>}, {transform_indices = @transform_3, window_bounds = array<i64: 1, 1, 128>}, {transform_indices = @transform_4, window_bounds = array<i64: 1, 1, 128>}]} {
    %c0 = arith.constant 0 : index
    %c0_0 = arith.constant 0 : index
    %0 = vector.load %arg1[%c0, %c0_0] : memref<64x16xf32, #tpu.memory_space<vmem>>, vector<64x16xf32>
    %c0_1 = arith.constant 0 : index
    %c0_2 = arith.constant 0 : index
    %1 = vector.load %arg2[%c0_1, %c0_2] : memref<64x1xi32, #tpu.memory_space<vmem>>, vector<64x1xi32>
    %cst = arith.constant dense<0xFF800000> : vector<64xf32>
    %2 = vector.multi_reduction <maximumf>, %0, %cst [1] : vector<64x16xf32> to vector<64xf32>
    %3 = vector.shape_cast %2 : vector<64xf32> to vector<64x1xf32>
    %4 = vector.broadcast %3 : vector<64x1xf32> to vector<64x16xf32>
    %5 = arith.subf %0, %4 : vector<64x16xf32>
    %6 = math.exp %5 : vector<64x16xf32>
    %cst_3 = arith.constant dense<0.000000e+00> : vector<64xf32>
    %7 = vector.multi_reduction <add>, %6, %cst_3 [1] : vector<64x16xf32> to vector<64xf32>
    %8 = vector.shape_cast %7 : vector<64xf32> to vector<64x1xf32>
    %9 = math.log %8 : vector<64x1xf32>
    %10 = arith.addf %3, %9 : vector<64x1xf32>
    %11 = tpu.iota {dimensions = array<i32: 1>} : vector<64x16xi32>
    %12 = vector.broadcast %1 : vector<64x1xi32> to vector<64x16xi32>
    %13 = arith.cmpi eq, %11, %12 : vector<64x16xi32>
    %cst_4 = arith.constant 0.000000e+00 : f32
    %14 = vector.broadcast %cst_4 : f32 to vector<64x16xf32>
    %15 = arith.select %13, %0, %14 : vector<64x16xi1>, vector<64x16xf32>
    %cst_5 = arith.constant dense<0.000000e+00> : vector<64xf32>
    %16 = vector.multi_reduction <add>, %15, %cst_5 [1] : vector<64x16xf32> to vector<64xf32>
    %17 = vector.shape_cast %16 : vector<64xf32> to vector<64x1xf32>
    %c-1_i32 = arith.constant -1 : i32
    %18 = vector.broadcast %c-1_i32 : i32 to vector<64x1xi32>
    %19 = arith.cmpi ne, %1, %18 : vector<64x1xi32>
    %20 = arith.subf %10, %17 : vector<64x1xf32>
    %cst_6 = arith.constant 0.000000e+00 : f32
    %21 = vector.broadcast %cst_6 : f32 to vector<64x1xf32>
    %22 = arith.select %19, %20, %21 : vector<64x1xi1>, vector<64x1xf32>
    %cst_7 = arith.constant 1.000000e+00 : f32
    %23 = vector.broadcast %cst_7 : f32 to vector<64x1xf32>
    %24 = arith.subf %23, %17 : vector<64x1xf32>
    %25 = arith.mulf %24, %24 : vector<64x1xf32>
    %cst_8 = arith.constant 0.000000e+00 : f32
    %26 = vector.broadcast %cst_8 : f32 to vector<64x1xf32>
    %27 = arith.select %19, %25, %26 : vector<64x1xi1>, vector<64x1xf32>
    %28 = vector.shape_cast %22 : vector<64x1xf32> to vector<1x64x1xf32>
    %cst_9 = arith.constant dense<0.000000e+00> : vector<1xf32>
    %29 = vector.multi_reduction <add>, %28, %cst_9 [1, 2] : vector<1x64x1xf32> to vector<1xf32>
    %30 = vector.shape_cast %29 : vector<1xf32> to vector<1x1x1xf32>
    %31 = vector.extract %30[0, 0, 0] : f32 from vector<1x1x1xf32>
    %32 = vector.broadcast %31 : f32 to vector<1x1xf32>
    %33 = vector.shape_cast %32 : vector<1x1xf32> to vector<1x1xf32>
    %34 = vector.broadcast %33 : vector<1x1xf32> to vector<1x128xf32>
    %c0_10 = arith.constant 0 : index
    %c0_11 = arith.constant 0 : index
    %c0_12 = arith.constant 0 : index
    %35 = vector.load %arg3[%c0_10, %c0_11, %c0_12] : memref<1x1x128xf32, #tpu.memory_space<vmem>>, vector<1x1x128xf32>
    %36 = vector.shape_cast %35 : vector<1x1x128xf32> to vector<1x128xf32>
    %37 = vector.shape_cast %34 : vector<1x128xf32> to vector<1x1x128xf32>
    tpu.vector_store %arg3[%c0_10, %c0_11, %c0_12], %37 {strides = array<i32>} : memref<1x1x128xf32, #tpu.memory_space<vmem>>, vector<1x1x128xf32>,
    %38 = vector.shape_cast %27 : vector<64x1xf32> to vector<1x64x1xf32>
    %cst_13 = arith.constant dense<0.000000e+00> : vector<1xf32>
    %39 = vector.multi_reduction <add>, %38, %cst_13 [1, 2] : vector<1x64x1xf32> to vector<1xf32>
    %40 = vector.shape_cast %39 : vector<1xf32> to vector<1x1x1xf32>
    %41 = vector.extract %40[0, 0, 0] : f32 from vector<1x1x1xf32>
    %42 = vector.broadcast %41 : f32 to vector<1x1xf32>
    %43 = vector.shape_cast %42 : vector<1x1xf32> to vector<1x1xf32>
    %44 = vector.broadcast %43 : vector<1x1xf32> to vector<1x128xf32>
    %c0_14 = arith.constant 0 : index
    %c0_15 = arith.constant 0 : index
    %c0_16 = arith.constant 0 : index
    %45 = vector.load %arg4[%c0_14, %c0_15, %c0_16] : memref<1x1x128xf32, #tpu.memory_space<vmem>>, vector<1x1x128xf32>
    %46 = vector.shape_cast %45 : vector<1x1x128xf32> to vector<1x128xf32>
    %47 = vector.shape_cast %44 : vector<1x128xf32> to vector<1x1x128xf32>
    tpu.vector_store %arg4[%c0_14, %c0_15, %c0_16], %47 {strides = array<i32>} : memref<1x1x128xf32, #tpu.memory_space<vmem>>, vector<1x1x128xf32>,
    %48 = arith.extui %19 : vector<64x1xi1> to vector<64x1xi32>
    %49 = arith.sitofp %48 : vector<64x1xi32> to vector<64x1xf32>
    %50 = vector.shape_cast %49 : vector<64x1xf32> to vector<1x64x1xf32>
    %cst_17 = arith.constant dense<0.000000e+00> : vector<1xf32>
    %51 = vector.multi_reduction <add>, %50, %cst_17 [1, 2] : vector<1x64x1xf32> to vector<1xf32>
    %52 = vector.shape_cast %51 : vector<1xf32> to vector<1x1x1xf32>
    %53 = vector.extract %52[0, 0, 0] : f32 from vector<1x1x1xf32>
    %54 = vector.broadcast %53 : f32 to vector<1x1xf32>
    %55 = vector.shape_cast %54 : vector<1x1xf32> to vector<1x1xf32>
    %56 = vector.broadcast %55 : vector<1x1xf32> to vector<1x128xf32>
    %c0_18 = arith.constant 0 : index
    %c0_19 = arith.constant 0 : index
    %c0_20 = arith.constant 0 : index
    %57 = vector.load %arg5[%c0_18, %c0_19, %c0_20] : memref<1x1x128xf32, #tpu.memory_space<vmem>>, vector<1x1x128xf32>
    %58 = vector.shape_cast %57 : vector<1x1x128xf32> to vector<1x128xf32>
    %59 = vector.shape_cast %56 : vector<1x128xf32> to vector<1x1x128xf32>
    tpu.vector_store %arg5[%c0_18, %c0_19, %c0_20], %59 {strides = array<i32>} : memref<1x1x128xf32, #tpu.memory_space<vmem>>, vector<1x1x128xf32>,
    return
  }
  func.func @transform_0(%arg0: i32) -> (i32, i32) {
    %c0_i32 = arith.constant 0 : i32
    %c0_i32_0 = arith.constant 0 : i32
    return %arg0, %c0_i32 : i32, i32
  }
  func.func @transform_1(%arg0: i32) -> (i32, i32) {
    %c0_i32 = arith.constant 0 : i32
    %c0_i32_0 = arith.constant 0 : i32
    return %arg0, %c0_i32 : i32, i32
  }
  func.func @transform_2(%arg0: i32) -> (i32, i32, i32) {
    %c0_i32 = arith.constant 0 : i32
    %c0_i32_0 = arith.constant 0 : i32
    %c0_i32_1 = arith.constant 0 : i32
    return %arg0, %c0_i32, %c0_i32_0 : i32, i32, i32
  }
  func.func @transform_3(%arg0: i32) -> (i32, i32, i32) {
    %c0_i32 = arith.constant 0 : i32
    %c0_i32_0 = arith.constant 0 : i32
    %c0_i32_1 = arith.constant 0 : i32
    return %arg0, %c0_i32, %c0_i32_0 : i32, i32, i32
  }
  func.func @transform_4(%arg0: i32) -> (i32, i32, i32) {
    %c0_i32 = arith.constant 0 : i32
    %c0_i32_0 = arith.constant 0 : i32
    %c0_i32_1 = arith.constant 0 : i32
    return %arg0, %c0_i32, %c0_i32_0 : i32, i32, i32
  }
}

</mosaic_0001>

<bundles_post_ra>
// kernel: pixel_prototype_ce_loss.2
= control target key start
LH: loop header
LB: loop body
LE: loop exit
PB: predicated region body
PF: predicated region fallthrough
CT: control target
= control target key end

     0   :  { %s792_s18 = smov 0   ;;  %s794_s19 = smov 0   ;;  %s889_s0 = inlined_call_operand.vmem [shape: f32[16,8], index: 0, kind: input, shape index: {}]   ;;  %s890_s1 = inlined_call_operand.vmem [shape: f32[8,16], index: 1, kind: input, shape index: {}]   ;;  %s891_s2 = inlined_call_operand.vmem [shape: f32[2,32,8], index: 2, kind: input, shape index: {}]   ;;  %s892_s3 = inlined_call_operand.vmem [shape: s32[2,16,16], index: 3, kind: input, shape index: {}]   ;;  %s893_s4 = inlined_call_operand.vmem [shape: f32[2,1,128], index: 4, kind: output, shape index: {0}]   ;;  %s894_s5 = inlined_call_operand.vmem [shape: f32[2,1,128], index: 5, kind: output, shape index: {1}]  }
   0x1   :  { %s796_s20 = smov 0   ;;  %s798_s21 = smov 0  }
   0x2   :  { %s800_s22 = smov 0  }
   0x3 LB: > { %s25_s23 = sadd.s32 1, %s750_s20  ;;  %s28_s24 = sadd.s32 1, %s754_s21  ;;  %s758_s22 = sphi %s800_s22, %s16_s22   ;;  %s754_s21 = sphi %s798_s21, %s900_s21   ;;  %s750_s20 = sphi %s796_s20, %s899_s20   ;;  %s746_s19 = sphi %s794_s19, %s898_s19   ;;  %s742_s18 = sphi %s792_s18, %s897_s18  }
   0x4   : > { %p26_p0 = scmp.ge.s32.totalorder %s25_s23, 2  ;;  %p637_p1 = scmp.ge.s32.totalorder %s758_s22, 1 }
   0x5   : > { %p226_p2 = scmp.lt.s32.totalorder %s758_s22, 5 }
   0x6   : > { %s902_s23 = smov (%p26_p0, %s25_s23), 0  ;;  %s904_s24 = smov (!%p26_p0, %s28_s24), %s754_s21 }
   0x7   : > { %p227_p3 = pnand %p637_p1, %p226_p2  ;;  %p30_p4 = scmp.ge.s32.totalorder %s904_s24, 2 }
   0x8   : > { %p267_p5 = scmp.lt.s32.totalorder (!%p227_p3), %s742_s18, 1  ;;  %p271_p6 = scmp.lt.s32.totalorder (!%p227_p3), %s746_s19, 1 }
   0x9   : > { %s906_s24 = smov (%p30_p4, %s904_s24), 0  ;;  %230 = sbr.rel (%p227_p3) target bundleno = 534 (0x216), region = 36 }
   0xa   : > { %895 = sst [smem:[#allocation5_spill]] %s906_s24  ;;  %p643_p7 = scmp.ne.s32.totalorder (!%p227_p3), %s742_s18, 0 }
   0xe   : > { %s268_s25 = scalar_select %p267_p5, %s742_s18, 1 }
   0xf   : > { %s908_s19 = smov (!%p271_p6, %s746_s19), 1 }
  0x10   : > { %s638_s26 = sshll.u32 %s268_s25, 3  ;;  %s656_s30 = sshll.u32 %s908_s19, 5 }
  0x11   : > { %s831_s29 = scalar_lea.vmem %s889_s0, %s638_s26  ;;  %s275_s8 = scalar_lea.vmem %s891_s2, %s656_s30 }
  0x12   : > { %s641_s9 = sshll.u32 %s908_s19, 1  ;;  %s286_s13 = scalar_lea.vmem %s893_s4, %s908_s19 }
  0x13   : > { %s281_s10 = sadd.s32 %s641_s9, %s268_s25  ;;  %s289_s17 = scalar_lea.vmem %s894_s5, %s908_s19 }
  0x14   : > { %s642_s14 = sshll.u32 %s281_s10, 3  ;;  %293 = sbr.rel (%p643_p7) target bundleno = 161 (0xa1), region = 40 }
  0x15   : > { %s849_s26 = scalar_lea.vmem %s892_s3, %s642_s14 }
  0x19   : > { %v298_v0 = vld [vmem:[%s890_s1] sm:$0xff]  ;;  %v296_v1 = vld [vmem:[%s275_s8 + $0x10] sm:$0xff]  ;;  %vm299_vm0 = vcmask 64512   ;;  %v297_v2 = vld [vmem:[%s275_s8 + $0x18] sm:$0xff]  ;;  %vm341_vm1 = vcmask 130048   ;;  %v760_v5 = vmov 0.0  }
  0x1a   : > { %658 = vmatpush.msra.mxu2 %v298_v0  ;;  %659 = vmatpush.msra.mxu3 %v298_v0  ;;  %v294_v3 = vld [vmem:[%s275_s8] sm:$0xff]  ;;  %v295_v4 = vld [vmem:[%s275_s8 + $0x8] sm:$0xff]  ;;  %346 = vst.msk [vmem:[#allocation3] sm:$0xff] %vm341_vm1, %v760_v5 }
  0x1b   : > { %646 = vmatmul.msk.f32.vlgmr.msra.gmra.mxu2 %vm299_vm0, %v296_v1  ;;  %647 = vmatmul.msk.f32.vlgmr.msra.gmra.mxu3 %vm299_vm0, %v297_v2  ;;  %347 = vst.msk [vmem:[#allocation4] sm:$0xff] %vm341_vm1, %v760_v5 }
  0x1c   : > { %327 = vmatpush.msra.mxu0 %v298_v0  ;;  %657 = vmatpush.msra.mxu1 %v298_v0 }
  0x1d   : > { %644 = vmatmul.msk.f32.vlgmr.msra.gmra.mxu0 %vm299_vm0, %v294_v3  ;;  %645 = vmatmul.msk.f32.vlgmr.msra.gmra.mxu1 %vm299_vm0, %v295_v4 }
  0x9a   : > { %v329_v6 = vpop.f32.mrf.mxu0  ;;  %v332_v7 = vpop.f32.mrf.mxu1 }
  0x9b   : > { %342 = vst.msk [vmem:[#allocation2] sm:$0xff] %vm341_vm1, %v329_v6 }
  0x9c   : > { %343 = vst.msk [vmem:[#allocation2 + $0x8] sm:$0xff] %vm341_vm1, %v332_v7 }
  0x9e   : > { %v335_v8 = vpop.f32.mrf.mxu2  ;;  %v338_v9 = vpop.f32.mrf.mxu3 }
  0x9f   : > { %344 = vst.msk [vmem:[#allocation2 + $0x10] sm:$0xff] %vm341_vm1, %v335_v8 }
  0xa0   : > { %345 = vst.msk [vmem:[#allocation2 + $0x18] sm:$0xff] %vm341_vm1, %v338_v9 }
  0xa1 PF: > { %v348_v11 = vld [vmem:[%s831_s29] sm:$0xff]  ;;  %vm351_vm2 = vcmask 64512   ;;  %v485_v33 = vld [vmem:[#allocation4] sm:$0xff]  ;;  %vm483_vm4 = vcmask 130048   ;;  %v761_v34 = vmov 0.0   ;;  %p653_p8 = scmp.ne.s32.totalorder %s742_s18, 1 }
  0xa2   : > { %v350_v12 = vld [vmem:[#allocation2] sm:$0xff] }
  0xa3   : > { %370 = vmatpush.msra.mxu0 %v350_v12  ;;  %v377_v13 = vld [vmem:[#allocation2 + $0x8] sm:$0xff]  ;;  %v349_v21 = vld [vmem:[%s849_s26] sm:$0xff] }
  0xa4   : > { %393 = vmatpush.msra.mxu1 %v377_v13  ;;  %648 = vmatmul.msk.f32.vlgmr.msra.gmra.mxu0 %vm351_vm2, %v348_v11  ;;  %vm478_vm3 = vcmp.ne.s32.totalorder %v349_v21, 4294967295  ;;  %vm375_vm5 = vcmp.eq.s32.totalorder %v349_v21, 0  ;;  %vm398_vm6 = vcmp.eq.s32.totalorder %v349_v21, 1  ;;  %vm430_vm7 = vcmp.eq.s32.totalorder %v349_v21, 2  ;;  %v479_v60 = vld [vmem:[#allocation3] sm:$0xff] }
  0xa5   : > { %649 = vmatmul.msk.f32.vlgmr.msra.gmra.mxu1 %vm351_vm2, %v348_v11  ;;  %v652_v35 = vsel %vm478_vm3, 1.0, %v761_v34  ;;  %vm463_vm8 = vcmp.eq.s32.totalorder %v349_v21, 3 }
  0xa6   : > { %v409_v10 = vld [vmem:[#allocation2 + $0x10] sm:$0xff]  ;;  %v488_v37 = vadd.f32 %v652_v35, %v485_v33 }
  0xa7   : > { %425 = vmatpush.msra.mxu2 %v409_v10  ;;  %v442_v14 = vld [vmem:[#allocation2 + $0x18] sm:$0xff] }
  0xa8   : > { %650 = vmatmul.msk.f32.vlgmr.msra.gmra.mxu2 %vm351_vm2, %v348_v11  ;;  %458 = vmatpush.msra.mxu3 %v442_v14  ;;  %489 = vst.msk [vmem:[#allocation4] sm:$0xff] %vm483_vm4, %v488_v37 }
  0xa9   : > { %651 = vmatmul.msk.f32.vlgmr.msra.gmra.mxu3 %vm351_vm2, %v348_v11 }
 0x121   : > { %v372_v15 = vpop.f32.mrf.mxu0 }
 0x122   : > { %v395_v16 = vpop.f32.mrf.mxu1  ;;  %v376_v49 = vsel %vm375_vm5, %v372_v15, 0.0 }
 0x123   : > { %v399_v17 = vmax.f32 %v372_v15, %v395_v16  ;;  %v407_v50 = vsel %vm398_vm6, %v395_v16, 0.0 }
 0x124   : > { %v408_v52 = vadd.f32 %v407_v50, %v376_v49 }
 0x125   : > { %v400_v18 = vsub.f32 %v372_v15, %v399_v17  ;;  %v403_v19 = vsub.f32 %v395_v16, %v399_v17 }
 0x127   : > { %v401_v22 = vmul.f32 1.442695, %v400_v18  ;;  %v404_v23 = vmul.f32 1.442695, %v403_v19 }
 0x129   : > { %706 = vpow2.f32 %v401_v22 }
 0x12a   : > { %708 = vpow2.f32 %v404_v23 }
 0x12b   : > { %v427_v20 = vpop.f32.mrf.mxu2 }
 0x12c   : > { %v431_v24 = vmax.f32 %v399_v17, %v427_v20  ;;  %v460_v25 = vpop.f32.mrf.mxu3  ;;  %v440_v53 = vsel %vm430_vm7, %v427_v20, 0.0 }
 0x12d   : > { %v441_v54 = vadd.f32 %v440_v53, %v408_v52  ;;  %v473_v56 = vsel %vm463_vm8, %v460_v25, 0.0 }
 0x12e   : > { %v432_v26 = vsub.f32 %v399_v17, %v431_v24  ;;  %v436_v27 = vsub.f32 %v427_v20, %v431_v24  ;;  %v464_v28 = vmax.f32 %v431_v24, %v460_v25 }
 0x12f   : > { %v707_v38 = vpop.eup %706  ;;  %v474_v58 = vadd.f32 %v473_v56, %v441_v54 }
 0x130   : > { %v433_v29 = vmul.f32 1.442695, %v432_v26  ;;  %v437_v30 = vmul.f32 1.442695, %v436_v27  ;;  %v465_v31 = vsub.f32 %v431_v24, %v464_v28  ;;  %v469_v32 = vsub.f32 %v460_v25, %v464_v28  ;;  %v709_v40 = vpop.eup %708 }
 0x131   : > { %v406_v41 = vadd.f32 %v709_v40, %v707_v38 }
 0x132   : > { %710 = vpow2.f32 %v433_v29  ;;  %v466_v36 = vmul.f32 1.442695, %v465_v31  ;;  %v470_v39 = vmul.f32 1.442695, %v469_v32 }
 0x133   : > { %712 = vpow2.f32 %v437_v30 }
 0x134   : > { %714 = vpow2.f32 %v466_v36 }
 0x135   : > { %716 = vpow2.f32 %v470_v39 }
 0x138   : > { %v711_v42 = vpop.eup %710 }
 0x139   : > { %v435_v43 = vmul.f32 %v711_v42, %v406_v41  ;;  %v713_v44 = vpop.eup %712 }
 0x13a   : > { %v715_v46 = vpop.eup %714 }
 0x13b   : > { %v439_v45 = vadd.f32 %v713_v44, %v435_v43  ;;  %v717_v48 = vpop.eup %716 }
 0x13d   : > { %v468_v47 = vmul.f32 %v715_v46, %v439_v45 }
 0x13f   : > { %v472_v51 = vadd.f32 %v717_v48, %v468_v47 }
 0x141   : > { %718 = vlog2.f32 %v472_v51 }
 0x147   : > { %v719_v55 = vpop.eup %718 }
 0x148   : > { %v476_v57 = vmul.f32 0.6931472, %v719_v55 }
 0x14a   : > { %v477_v59 = vadd.f32 %v476_v57, %v464_v28 }
 0x14c   : > { %v480_v61 = vsub.f32 %v477_v59, %v474_v58 }
 0x14d   : > { %493 = sbr.rel (%p653_p8) target bundleno = 534 (0x216), region = 44 }
 0x14e   : > { %v481_v62 = vsel %vm478_vm3, %v480_v61, 0.0 }
 0x14f   : > { %v482_v63 = vadd.f32 %v481_v62, %v479_v60 }
 0x151   : > { %484 = vst.msk [vmem:[#allocation3] sm:$0xff] %vm483_vm4, %v482_v63 }
 0x152   : > { %v507_v2 = vld [vmem:[#allocation4] sm:$0xff] }
 0x153   : > { %v508_v3 = vsel %vm483_vm4, %v507_v2, 0.0 }
 0x158   : > { %v494_v0 = vld [vmem:[#allocation3] sm:$0xff] }
 0x159   : > { %v495_v1 = vsel %vm483_vm4, %v494_v0, 0.0 }
 0x15a   : > { %496 = vadd.xlane.f32.xlu0 %v495_v1 }
 0x162   : > { %509 = vadd.xlane.f32.xlu0 %v508_v3 }
 0x1cd   : > { %v497_v4 = vpop.xlane.xlu0 %496 }
 0x1ce   : > { %v498_v5 = vrot.slane %v497_v4, 4 }
 0x1d0   : > { %v499_v6 = vadd.f32 %v498_v5, %v497_v4 }
 0x1d2   : > { %v500_v7 = vrot.slane %v499_v6, 2 }
 0x1d4   : > { %v501_v8 = vadd.f32 %v500_v7, %v499_v6 }
 0x1d5   : > { %v510_v9 = vpop.xlane.xlu0 %509 }
 0x1d6   : > { %v511_v10 = vrot.slane %v510_v9, 4  ;;  %v502_v11 = vrot.slane %v501_v8, 1 }
 0x1d8   : > { %v512_v12 = vadd.f32 %v511_v10, %v510_v9  ;;  %v503_v13 = vadd.f32 %v502_v11, %v501_v8 }
 0x1da   : > { %v513_v14 = vrot.slane %v512_v12, 2  ;;  %660 = vpush %v503_v13 }
 0x1dc   : > { %v514_v15 = vadd.f32 %v513_v14, %v512_v12 }
 0x1de   : > { %v515_v16 = vrot.slane %v514_v15, 1 }
 0x1e0   : > { %v516_v17 = vadd.f32 %v515_v16, %v514_v15 }
 0x1e2   : > { %662 = vpush %v516_v17 }
 0x20b   : > { %s661_s18 = spop %660 }
 0x20c   : > { %v505_v18 = vstv %s661_s18 }
 0x20d   : > { %506 = vst [vmem:[%s286_s13] sm:$0x1] %v505_v18 }
 0x213   : > { %s663_s29 = spop %662 }
 0x214   : > { %v518_v19 = vstv %s663_s29 }
 0x215   : > { %519 = vst [vmem:[%s289_s17] sm:$0x1] %v518_v19 }
 0x216 PF: > { %s16_s22 = sadd.s32 1, %s758_s22   ;;  %s896_s8 = sld [smem:[#allocation5_spill]] }
 0x217   : > { %p13_p9 = scmp.ge.s32.totalorder %s16_s22, 6   ;;  %s897_s18 = smov %s750_s20 }
 0x218   : > { %s898_s19 = smov %s754_s21  ;;  %s899_s20 = smov %s902_s23 }
 0x219   :  { %15 = sbr.rel (!%p13_p9) target bundleno = 3 (0x3), region = 92 }
 0x21c   : > { %s900_s21 = smov %s896_s8 }

// kernel: pixel_prototype_ce_loss.3
= control target key start
LH: loop header
LB: loop body
LE: loop exit
PB: predicated region body
PF: predicated region fallthrough
CT: control target
= control target key end

     0   :  { %s771_s15 = smov 0   ;;  %s1051_s0 = inlined_call_operand.vmem [shape: f32[128,16], index: 0, kind: input, shape index: {}]   ;;  %s1052_s1 = inlined_call_operand.vmem [shape: s32[128,1], index: 1, kind: input, shape index: {}]   ;;  %s1053_s2 = inlined_call_operand.vmem [shape: f32[2,1,128], index: 2, kind: output, shape index: {0}]   ;;  %s1054_s3 = inlined_call_operand.vmem [shape: f32[2,1,128], index: 3, kind: output, shape index: {1}]   ;;  %s1055_s4 = inlined_call_operand.vmem [shape: f32[2,1,128], index: 4, kind: output, shape index: {2}]  }
   0x1 LB: > { %s777_s16 = sadd.s32 4294967295, %s742_s15   ;;  %p670_p0 = scmp.ge.s32.totalorder %s742_s15, 1  ;;  %s742_s15 = sphi %s771_s15, %s15_s15  }
   0x2   : > { %p179_p1 = scmp.lt.s32.totalorder %s742_s15, 3 }
   0x4   : > { %p180_p2 = pnand %p670_p0, %p179_p1 }
   0x5   : > { %s671_s17 = sshll.u32 (!%p180_p2), %s777_s16, 3  ;;  %p226_p4 = scmp.lt.s32.totalorder (!%p180_p2), %s777_s16, 1 }
   0x6   : > { %183 = sbr.rel (%p180_p2) target bundleno = 512 (0x200), region = 28  ;;  %p215_p3 = scmp.lt.s32.totalorder (!%p180_p2), %s671_s17, 15 }
   0xb   : > { %v744_v0 = vmov 0   ;;  %s1057_s17 = smov (!%p215_p3, %s671_s17), 15  ;;  %vm251_vm0 = vcmask 130048   ;;  %vm462_vm2 = vcmask 7168   ;;  %v745_v11 = vmov 0.0   ;;  %s1059_s16 = smov (!%p226_p4, %s777_s16), 1 }
   0xc   : > { %701 = vset.pattern.permute.xlu2 %v744_v0  ;;  %702 = vset.pattern.permute.xlu0 %v744_v0  ;;  %s672_s18 = sshll.u32 %s1057_s17, 3  ;;  %v348_v48 = vlaneseq  ;;  %s228_s27 = scalar_lea.vmem %s1053_s2, %s1059_s16 }
   0xd   : > { %703 = vset.pattern.permute.xlu1 %v744_v0  ;;  %s785_s21 = scalar_lea.vmem %s1051_s0, %s672_s18  ;;  %s790_s24 = scalar_lea.vmem %s1052_s1, %s672_s18 }
   0xe   : > { %v793_v1 = vld [vmem:[%s785_s21 + $0x20] sm:$0xff]  ;;  %v796_v2 = vld [vmem:[%s785_s21 + $0x10] sm:$0xff]  ;;  %v812_v8 = vld [vmem:[%s790_s24 + $0x8] sm:$0xff]  ;;  %v908_v53 = vand.u32 127, %v348_v48  ;;  %s231_s5 = scalar_lea.vmem %s1054_s3, %s1059_s16  ;;  %s234_s9 = scalar_lea.vmem %s1055_s4, %s1059_s16 }
   0xf   : > { %v799_v3 = vld [vmem:[%s785_s21] sm:$0xff]  ;;  %v264_v4 = vsel %vm251_vm0, %v793_v1, -inf  ;;  %v258_v5 = vsel %vm251_vm0, %v796_v2, -inf  ;;  %v815_v9 = vld [vmem:[%s785_s21 + $0x28] sm:$0xff]  ;;  %v818_v10 = vld [vmem:[%s785_s21 + $0x18] sm:$0xff]  ;;  %vm415_vm3 = vcmp.ne.s32.totalorder %v812_v8, 4294967295 }
  0x10   : > { %v252_v6 = vsel %vm251_vm0, %v799_v3, -inf  ;;  %265 = vmax.xlane.f32.xlu2 %v264_v4  ;;  %259 = vmax.xlane.f32.xlu1 %v258_v5  ;;  %v808_v7 = vld [vmem:[%s790_s24] sm:$0xff]  ;;  %v825_v13 = vld [vmem:[%s785_s21 + $0x8] sm:$0xff]  ;;  %v676_v15 = vsel %vm415_vm3, 1.0, %v745_v11  ;;  %v267_v17 = vsel %vm251_vm0, %v815_v9, -inf  ;;  %v261_v18 = vsel %vm251_vm0, %v818_v10, -inf }
  0x11   : > { %253 = vmax.xlane.f32.xlu0 %v252_v6  ;;  %vm414_vm1 = vcmp.ne.s32.totalorder %v808_v7, 4294967295  ;;  %v532_v16 = vsel %vm462_vm2, %v676_v15, 0.0  ;;  %v255_v20 = vsel %vm251_vm0, %v825_v13, -inf  ;;  %v839_v21 = vld [vmem:[%s790_s24 + $0x18] sm:$0xff]  ;;  %v846_v23 = vld [vmem:[%s790_s24 + $0x10] sm:$0xff]  ;;  %v850_v24 = vld [vmem:[%s790_s24 + $0x20] sm:$0xff] }
  0x12   : > { %v675_v12 = vsel %vm414_vm1, 1.0, %v745_v11  ;;  %vm417_vm4 = vcmp.ne.s32.totalorder %v839_v21, 4294967295  ;;  %vm416_vm5 = vcmp.ne.s32.totalorder %v846_v23, 4294967295  ;;  %v853_v25 = vld [vmem:[%s785_s21 + $0x38] sm:$0xff]  ;;  %vm418_vm6 = vcmp.ne.s32.totalorder %v850_v24, 4294967295  ;;  %v860_v27 = vld [vmem:[%s785_s21 + $0x30] sm:$0xff] }
  0x13   : > { %v531_v14 = vsel %vm462_vm2, %v675_v12, 0.0  ;;  %v678_v22 = vsel %vm417_vm4, 1.0, %v745_v11  ;;  %v677_v26 = vsel %vm416_vm5, 1.0, %v745_v11  ;;  %v679_v30 = vsel %vm418_vm6, 1.0, %v745_v11  ;;  %v879_v37 = vld [vmem:[%s790_s24 + $0x28] sm:$0xff]  ;;  %v884_v38 = vld [vmem:[%s790_s24 + $0x30] sm:$0xff] }
  0x14   : > { %v533_v19 = vadd.f32 %v532_v16, %v531_v14  ;;  %v536_v28 = vsel %vm462_vm2, %v678_v22, 0.0  ;;  %v534_v29 = vsel %vm462_vm2, %v677_v26, 0.0  ;;  %v273_v32 = vsel %vm251_vm0, %v853_v25, -inf  ;;  %v887_v39 = vld [vmem:[%s790_s24 + $0x38] sm:$0xff] }
  0x15   : > { %v538_v33 = vsel %vm462_vm2, %v679_v30, 0.0  ;;  %v270_v34 = vsel %vm251_vm0, %v860_v27, -inf  ;;  %vm419_vm15 = vcmp.ne.s32.totalorder %v879_v37, 4294967295 }
  0x16   : > { %v535_v31 = vadd.f32 %v534_v29, %v533_v19 }
  0x18   : > { %268 = vmax.xlane.f32.xlu2 %v267_v17  ;;  %262 = vmax.xlane.f32.xlu1 %v261_v18  ;;  %v537_v35 = vadd.f32 %v536_v28, %v535_v31 }
  0x19   : > { %256 = vmax.xlane.f32.xlu0 %v255_v20 }
  0x1a   : > { %v872_v36 = vadd.f32 %v538_v33, %v537_v35 }
  0x20   : > { %274 = vmax.xlane.f32.xlu1 %v273_v32 }
  0x21   : > { %271 = vmax.xlane.f32.xlu0 %v270_v34 }
  0x30   : > { %351 = vperm.xlu2 %701, %v808_v7  }
  0x35   : > { %354 = vperm.xlu0 %702, %v812_v8  }
  0x38   : > { %360 = vperm.xlu2 %701, %v839_v21  }
  0x39   : > { %357 = vperm.xlu1 %703, %v846_v23  }
  0x40   : > { %363 = vperm.xlu2 %701, %v850_v24  }
  0x41   : > { %366 = vperm.xlu1 %703, %v879_v37  }
  0x48   : > { %369 = vperm.xlu2 %701, %v884_v38  }
  0x49   : > { %372 = vperm.xlu1 %703, %v887_v39  }
  0x83   : > { %v891_v40 = vpop.xlane.xlu2 %265  ;;  %v893_v41 = vpop.xlane.xlu1 %259 }
  0x84   : > { %v278_v42 = vsub.f32 %v796_v2, %v893_v41  ;;  %v897_v43 = vpop.xlane.xlu0 %253 }
  0x85   : > { %v276_v17 = vsub.f32 %v799_v3, %v897_v43 }
  0x86   : > { %v288_v44 = vmul.f32 1.442695, %v278_v42 }
  0x87   : > { %v284_v22 = vmul.f32 1.442695, %v276_v17 }
  0x88   : > { %704 = vpow2.f32 %v288_v44 }
  0x8b   : > { %v899_v45 = vpop.xlane.xlu2 %268  ;;  %v910_v54 = vpop.xlane.xlu1 %262 }
  0x8c   : > { %v281_v46 = vsub.f32 %v815_v9, %v899_v45  ;;  %v903_v47 = vpop.xlane.xlu0 %256  ;;  %v279_v57 = vsub.f32 %v818_v10, %v910_v54 }
  0x8d   : > { %v277_v49 = vsub.f32 %v825_v13, %v903_v47 }
  0x8e   : > { %v294_v50 = vmul.f32 1.442695, %v281_v46  ;;  %v705_v51 = vpop.eup %704  ;;  %v290_v4 = vmul.f32 1.442695, %v279_v57 }
  0x8f   : > { %v306_v52 = vsel %vm251_vm0, %v705_v51, 0.0  ;;  %v286_v55 = vmul.f32 1.442695, %v277_v49 }
  0x90   : > { %706 = vpow2.f32 %v294_v50  ;;  %307 = vadd.xlane.f32.xlu1 %v306_v52 }
  0x91   : > { %708 = vpow2.f32 %v286_v55 }
  0x93   : > { %v352_v56 = vpop.permute.xlu2 %351  ;;  %v926_v18 = vpop.xlane.xlu1 %274 }
  0x94   : > { %vm374_vm7 = vcmp.eq.s32.totalorder %v908_v53, %v352_v56  ;;  %v915_v58 = vpop.xlane.xlu0 %271 }
  0x95   : > { %v282_v59 = vsub.f32 %v860_v27, %v915_v58  ;;  %v382_v60 = vsel %vm374_vm7, %v799_v3, 0.0  ;;  %v280_v3 = vsub.f32 %v793_v1, %v891_v40  ;;  %vm421_vm7 = vcmp.ne.s32.totalorder %v887_v39, 4294967295 }
  0x96   : > { %v707_v61 = vpop.eup %706  ;;  %v390_v62 = vsel %vm251_vm0, %v382_v60, 0.0 }
  0x97   : > { %v296_v63 = vmul.f32 1.442695, %v282_v59  ;;  %391 = vadd.xlane.f32.xlu2 %v390_v62  ;;  %v315_v0 = vsel %vm251_vm0, %v707_v61, 0.0  ;;  %v709_v5 = vpop.eup %708 }
  0x98   : > { %316 = vadd.xlane.f32.xlu1 %v315_v0  ;;  %v303_v12 = vsel %vm251_vm0, %v709_v5, 0.0 }
  0x99   : > { %710 = vpow2.f32 %v296_v63 }
  0x9a   : > { %712 = vpow2.f32 %v290_v4 }
  0x9b   : > { %v361_v6 = vpop.permute.xlu2 %360  ;;  %714 = vpow2.f32 %v284_v22 }
  0x9c   : > { %vm377_vm8 = vcmp.eq.s32.totalorder %v908_v53, %v361_v6  ;;  %v680_v6 = vsel %vm419_vm15, 1.0, %v745_v11 }
  0x9d   : > { %v385_v26 = vsel %vm377_vm8, %v818_v10, 0.0  ;;  %v292_v10 = vmul.f32 1.442695, %v280_v3  ;;  %v682_v3 = vsel %vm421_vm7, 1.0, %v745_v11 }
  0x9e   : > { %v399_v29 = vsel %vm251_vm0, %v385_v26, 0.0 }
  0x9f   : > { %v711_v14 = vpop.eup %710  ;;  %304 = vadd.xlane.f32.xlu2 %v303_v12  ;;  %716 = vpow2.f32 %v292_v10 }
  0xa0   : > { %v318_v15 = vsel %vm251_vm0, %v711_v14, 0.0  ;;  %v713_v16 = vpop.eup %712 }
  0xa1   : > { %319 = vadd.xlane.f32.xlu1 %v318_v15  ;;  %v309_v20 = vsel %vm251_vm0, %v713_v16, 0.0  ;;  %v715_v46 = vpop.eup %714 }
  0xa2   : > { %v300_v48 = vsel %vm251_vm0, %v715_v46, 0.0 }
  0xa3   : > { %v364_v19 = vpop.permute.xlu2 %363 }
  0xa4   : > { %vm378_vm12 = vcmp.eq.s32.totalorder %v908_v53, %v364_v19 }
  0xa5   : > { %v717_v51 = vpop.eup %716 }
  0xa6   : > { %v312_v52 = vsel %vm251_vm0, %v717_v51, 0.0 }
  0xa7   : > { %v355_v28 = vpop.permute.xlu0 %354  ;;  %310 = vadd.xlane.f32.xlu2 %v309_v20 }
  0xa8   : > { %vm375_vm9 = vcmp.eq.s32.totalorder %v908_v53, %v355_v28 }
  0xa9   : > { %400 = vadd.xlane.f32.xlu1 %v399_v29  ;;  %v383_v30 = vsel %vm375_vm9, %v825_v13, 0.0  ;;  %v283_v13 = vsub.f32 %v853_v25, %v926_v18 }
  0xaa   : > { %v393_v31 = vsel %vm251_vm0, %v383_v30, 0.0 }
  0xab   : > { %394 = vadd.xlane.f32.xlu0 %v393_v31  ;;  %v370_v32 = vpop.permute.xlu2 %369  ;;  %v358_v33 = vpop.permute.xlu1 %357 }
  0xac   : > { %vm380_vm10 = vcmp.eq.s32.totalorder %v908_v53, %v370_v32  ;;  %vm376_vm11 = vcmp.eq.s32.totalorder %v908_v53, %v358_v33 }
  0xad   : > { %v384_v34 = vsel %vm376_vm11, %v796_v2, 0.0  ;;  %v388_v35 = vsel %vm380_vm10, %v860_v27, 0.0  ;;  %v386_v2 = vsel %vm378_vm12, %v793_v1, 0.0  ;;  %v298_v27 = vmul.f32 1.442695, %v283_v13 }
  0xae   : > { %v396_v42 = vsel %vm251_vm0, %v384_v34, 0.0  ;;  %v408_v44 = vsel %vm251_vm0, %v388_v35, 0.0  ;;  %v402_v50 = vsel %vm251_vm0, %v386_v2, 0.0  ;;  %v544_v35 = vsel %vm462_vm2, %v682_v3, 0.0 }
  0xaf   : > { %397 = vadd.xlane.f32.xlu2 %v396_v42  ;;  %718 = vpow2.f32 %v298_v27 }
  0xb1   : > { %409 = vadd.xlane.f32.xlu1 %v408_v44 }
  0xb3   : > { %301 = vadd.xlane.f32.xlu0 %v300_v48  ;;  %v367_v49 = vpop.permute.xlu1 %366 }
  0xb4   : > { %vm379_vm14 = vcmp.eq.s32.totalorder %v908_v53, %v367_v49 }
  0xb5   : > { %v719_v59 = vpop.eup %718  ;;  %v387_v60 = vsel %vm379_vm14, %v815_v9, 0.0  ;;  %v540_v9 = vsel %vm462_vm2, %v680_v6, 0.0 }
  0xb6   : > { %v321_v1 = vsel %vm251_vm0, %v719_v59, 0.0  ;;  %v405_v61 = vsel %vm251_vm0, %v387_v60, 0.0  ;;  %v541_v20 = vadd.f32 %v540_v9, %v872_v36 }
  0xb7   : > { %403 = vadd.xlane.f32.xlu2 %v402_v50 }
  0xbb   : > { %313 = vadd.xlane.f32.xlu0 %v312_v52  ;;  %v373_v55 = vpop.permute.xlu1 %372 }
  0xbc   : > { %vm381_vm13 = vcmp.eq.s32.totalorder %v908_v53, %v373_v55 }
  0xbd   : > { %v389_v56 = vsel %vm381_vm13, %v853_v25, 0.0 }
  0xbe   : > { %v411_v57 = vsel %vm251_vm0, %v389_v56, 0.0  ;;  %vm420_vm0 = vcmp.ne.s32.totalorder %v884_v38, 4294967295 }
  0xbf   : > { %412 = vadd.xlane.f32.xlu2 %v411_v57  ;;  %v681_v15 = vsel %vm420_vm0, 1.0, %v745_v11 }
  0xc0   : > { %v542_v28 = vsel %vm462_vm2, %v681_v15, 0.0 }
  0xc1   : > { %v543_v10 = vadd.f32 %v542_v28, %v541_v20 }
  0xc3   : > { %322 = vadd.xlane.f32.xlu0 %v321_v1  ;;  %v545_v49 = vadd.f32 %v544_v35, %v543_v10 }
  0xc7   : > { %546 = vadd.xlane.f32.xlu2 %v545_v49 }
  0xcb   : > { %406 = vadd.xlane.f32.xlu0 %v405_v61 }
 0x103   : > { %v308_v62 = vpop.xlane.xlu1 %307 }
 0x10a   : > { %v957_v63 = vpop.xlane.xlu2 %391 }
 0x10b   : > { %v317_v0 = vpop.xlane.xlu1 %316  ;;  %v438_v5 = vsub.f32 1.0, %v957_v63 }
 0x10d   : > { %v446_v14 = vmul.f32 %v438_v5, %v438_v5 }
 0x10f   : > { %v454_v22 = vsel %vm414_vm1, %v446_v14, 0.0 }
 0x110   : > { %v489_v36 = vsel %vm462_vm2, %v454_v22, 0.0 }
 0x112   : > { %v305_v4 = vpop.xlane.xlu2 %304 }
 0x113   : > { %720 = vlog2.f32 %v305_v4 }
 0x114   : > { %v320_v25 = vpop.xlane.xlu1 %319  ;;  %722 = vlog2.f32 %v308_v62 }
 0x119   : > { %v721_v30 = vpop.eup %720 }
 0x11a   : > { %v311_v53 = vpop.xlane.xlu2 %310  ;;  %v723_v46 = vpop.eup %722  ;;  %v327_v13 = vmul.f32 0.6931472, %v721_v30 }
 0x11b   : > { %724 = vlog2.f32 %v311_v53  ;;  %v329_v51 = vmul.f32 0.6931472, %v723_v46 }
 0x11c   : > { %v964_v12 = vpop.xlane.xlu1 %400  ;;  %v341_v57 = vadd.f32 %v327_v13, %v903_v47 }
 0x11d   : > { %v441_v17 = vsub.f32 1.0, %v964_v12  ;;  %v342_v62 = vadd.f32 %v329_v51, %v893_v41 }
 0x11e   : > { %v395_v16 = vpop.xlane.xlu0 %394 }
 0x11f   : > { %v439_v19 = vsub.f32 1.0, %v395_v16  ;;  %v449_v31 = vmul.f32 %v441_v17, %v441_v17  ;;  %v423_v6 = vsub.f32 %v341_v57, %v395_v16 }
 0x121   : > { %v447_v26 = vmul.f32 %v439_v19, %v439_v19  ;;  %v725_v11 = vpop.eup %724  ;;  %v457_v2 = vsel %vm417_vm4, %v449_v31, 0.0 }
 0x122   : > { %v398_v29 = vpop.xlane.xlu2 %397  ;;  %v331_v55 = vmul.f32 0.6931472, %v725_v11  ;;  %v494_v56 = vsel %vm462_vm2, %v457_v2, 0.0 }
 0x123   : > { %v455_v32 = vsel %vm415_vm3, %v447_v26, 0.0  ;;  %v440_v33 = vsub.f32 1.0, %v398_v29  ;;  %v424_v15 = vsub.f32 %v342_v62, %v398_v29 }
 0x124   : > { %v490_v34 = vsel %vm462_vm2, %v455_v32, 0.0  ;;  %v343_v5 = vadd.f32 %v331_v55, %v910_v54  ;;  %v410_v23 = vpop.xlane.xlu1 %409 }
 0x125   : > { %v491_v42 = vadd.f32 %v490_v34, %v489_v36  ;;  %v448_v44 = vmul.f32 %v440_v33, %v440_v33  ;;  %v432_v20 = vsel %vm416_vm5, %v424_v15, 0.0  ;;  %v444_v35 = vsub.f32 1.0, %v410_v23 }
 0x126   : > { %v302_v48 = vpop.xlane.xlu0 %301  ;;  %v425_v41 = vsub.f32 %v343_v5, %v964_v12  ;;  %v466_v30 = vsel %vm462_vm2, %v432_v20, 0.0 }
 0x127   : > { %v456_v27 = vsel %vm416_vm5, %v448_v44, 0.0  ;;  %726 = vlog2.f32 %v302_v48 }
 0x128   : > { %v492_v50 = vsel %vm462_vm2, %v456_v27, 0.0  ;;  %728 = vlog2.f32 %v320_v25  ;;  %v431_v25 = vsel %vm415_vm3, %v423_v6, 0.0  ;;  %v433_v12 = vsel %vm417_vm4, %v425_v41, 0.0 }
 0x129   : > { %v493_v52 = vadd.f32 %v492_v50, %v491_v42  ;;  %v468_v33 = vsel %vm462_vm2, %v433_v12, 0.0  ;;  %v452_v27 = vmul.f32 %v444_v35, %v444_v35 }
 0x12a   : > { %v404_v59 = vpop.xlane.xlu2 %403 }
 0x12b   : > { %v442_v1 = vsub.f32 1.0, %v404_v59  ;;  %v495_v60 = vadd.f32 %v494_v56, %v493_v52 }
 0x12d   : > { %v727_v61 = vpop.eup %726  ;;  %v450_v4 = vmul.f32 %v442_v1, %v442_v1 }
 0x12e   : > { %v325_v53 = vmul.f32 0.6931472, %v727_v61  ;;  %v314_v9 = vpop.xlane.xlu0 %313  ;;  %v729_v16 = vpop.eup %728 }
 0x12f   : > { %v458_v14 = vsel %vm418_vm6, %v450_v4, 0.0  ;;  %730 = vlog2.f32 %v314_v9 }
 0x130   : > { %732 = vlog2.f32 %v317_v0  ;;  %v340_v47 = vadd.f32 %v325_v53, %v897_v43  ;;  %v496_v17 = vsel %vm462_vm2, %v458_v14, 0.0  ;;  %v464_v43 = vsel %vm462_vm2, %v431_v25, 0.0 }
 0x131   : > { %v497_v19 = vadd.f32 %v496_v17, %v495_v60 }
 0x132   : > { %v422_v54 = vsub.f32 %v340_v47, %v957_v63  ;;  %v337_v63 = vmul.f32 0.6931472, %v729_v16  ;;  %v413_v36 = vpop.xlane.xlu2 %412 }
 0x133   : > { %v445_v13 = vsub.f32 1.0, %v413_v36 }
 0x134   : > { %v430_v0 = vsel %vm414_vm1, %v422_v54, 0.0  ;;  %v346_v21 = vadd.f32 %v337_v63, %v915_v58 }
 0x135   : > { %v731_v22 = vpop.eup %730  ;;  %v463_v26 = vsel %vm462_vm2, %v430_v0, 0.0  ;;  %v453_v24 = vmul.f32 %v445_v13, %v445_v13 }
 0x136   : > { %v733_v28 = vpop.eup %732  ;;  %v465_v8 = vadd.f32 %v464_v43, %v463_v26  ;;  %v333_v29 = vmul.f32 0.6931472, %v731_v22  ;;  %v323_v3 = vpop.xlane.xlu0 %322  ;;  %v428_v46 = vsub.f32 %v346_v21, %v410_v23 }
 0x137   : > { %734 = vlog2.f32 %v323_v3  ;;  %v335_v32 = vmul.f32 0.6931472, %v733_v28  ;;  %v461_v6 = vsel %vm421_vm7, %v453_v24, 0.0 }
 0x138   : > { %v344_v7 = vadd.f32 %v333_v29, %v891_v40  ;;  %v467_v31 = vadd.f32 %v466_v30, %v465_v8  ;;  %v436_v58 = vsel %vm420_vm0, %v428_v46, 0.0  ;;  %v502_v14 = vsel %vm462_vm2, %v461_v6, 0.0 }
 0x139   : > { %v345_v48 = vadd.f32 %v335_v32, %v899_v45  ;;  %v474_v62 = vsel %vm462_vm2, %v436_v58, 0.0 }
 0x13a   : > { %v426_v10 = vsub.f32 %v344_v7, %v404_v59  ;;  %v469_v34 = vadd.f32 %v468_v33, %v467_v31  ;;  %v460_v59 = vsel %vm420_vm0, %v452_v27, 0.0  ;;  %v547_v47 = vpop.xlane.xlu2 %546 }
 0x13b   : > { %v500_v38 = vsel %vm462_vm2, %v460_v59, 0.0  ;;  %v548_v17 = vrot.slane %v547_v47, 4 }
 0x13c   : > { %v434_v42 = vsel %vm418_vm6, %v426_v10, 0.0 }
 0x13d   : > { %v735_v44 = vpop.eup %734  ;;  %v470_v40 = vsel %vm462_vm2, %v434_v42, 0.0  ;;  %v549_v41 = vadd.f32 %v548_v17, %v547_v47 }
 0x13e   : > { %v339_v49 = vmul.f32 0.6931472, %v735_v44  ;;  %v407_v11 = vpop.xlane.xlu0 %406  ;;  %v471_v2 = vadd.f32 %v470_v40, %v469_v34 }
 0x13f   : > { %v427_v50 = vsub.f32 %v345_v48, %v407_v11  ;;  %v443_v51 = vsub.f32 1.0, %v407_v11  ;;  %v550_v16 = vrot.slane %v549_v41, 2 }
 0x140   : > { %v347_v52 = vadd.f32 %v339_v49, %v926_v18 }
 0x141   : > { %v435_v55 = vsel %vm419_vm15, %v427_v50, 0.0  ;;  %v451_v56 = vmul.f32 %v443_v51, %v443_v51  ;;  %v551_v43 = vadd.f32 %v550_v16, %v549_v41 }
 0x142   : > { %v472_v45 = vsel %vm462_vm2, %v435_v55, 0.0  ;;  %v429_v57 = vsub.f32 %v347_v52, %v413_v36 }
 0x143   : > { %v459_v1 = vsel %vm419_vm15, %v451_v56, 0.0  ;;  %v473_v60 = vadd.f32 %v472_v45, %v471_v2  ;;  %v552_v29 = vrot.slane %v551_v43, 1 }
 0x144   : > { %v498_v18 = vsel %vm462_vm2, %v459_v1, 0.0  ;;  %v437_v61 = vsel %vm421_vm7, %v429_v57, 0.0 }
 0x145   : > { %v475_v4 = vadd.f32 %v474_v62, %v473_v60  ;;  %v476_v5 = vsel %vm462_vm2, %v437_v61, 0.0  ;;  %v499_v53 = vadd.f32 %v498_v18, %v497_v19  ;;  %v553_v23 = vadd.f32 %v552_v29, %v551_v43 }
 0x147   : > { %v477_v9 = vadd.f32 %v476_v5, %v475_v4  ;;  %v501_v37 = vadd.f32 %v500_v38, %v499_v53 }
 0x149   : > { %478 = vadd.xlane.f32.xlu0 %v477_v9  ;;  %v503_v15 = vadd.f32 %v502_v14, %v501_v37 }
 0x14b   : > { %504 = vadd.xlane.f32.xlu1 %v503_v15 }
 0x1bc   : > { %v479_v25 = vpop.xlane.xlu0 %478 }
 0x1bd   : > { %v480_v54 = vrot.slane %v479_v25, 4 }
 0x1be   : > { %v505_v20 = vpop.xlane.xlu1 %504 }
 0x1bf   : > { %v481_v0 = vadd.f32 %v480_v54, %v479_v25  ;;  %v506_v39 = vrot.slane %v505_v20, 4 }
 0x1c1   : > { %v482_v19 = vrot.slane %v481_v0, 2  ;;  %v507_v22 = vadd.f32 %v506_v39, %v505_v20 }
 0x1c3   : > { %v508_v26 = vrot.slane %v507_v22, 2  ;;  %v483_v28 = vadd.f32 %v482_v19, %v481_v0 }
 0x1c5   : > { %v509_v12 = vadd.f32 %v508_v26, %v507_v22  ;;  %v484_v8 = vrot.slane %v483_v28, 1 }
 0x1c7   : > { %v485_v3 = vadd.f32 %v484_v8, %v483_v28  ;;  %v510_v63 = vrot.slane %v509_v12, 1 }
 0x1c9   : > { %685 = vpush %v485_v3  ;;  %v511_v30 = vadd.f32 %v510_v63, %v509_v12 }
 0x1cb   : > { %687 = vpush %v511_v30 }
 0x1cc   : > { %689 = vpush %v553_v23 }
 0x1fa   : > { %s686_s28 = spop %685 }
 0x1fb   : > { %v487_v7 = vstv %s686_s28 }
 0x1fc   : > { %488 = vst [vmem:[%s228_s27] sm:$0x1] %v487_v7  ;;  %s688_s6 = spop %687 }
 0x1fd   : > { %v513_v31 = vstv %s688_s6  ;;  %s690_s10 = spop %689 }
 0x1fe   : > { %514 = vst [vmem:[%s231_s5] sm:$0x1] %v513_v31  ;;  %v555_v32 = vstv %s690_s10 }
 0x1ff   : > { %556 = vst [vmem:[%s234_s9] sm:$0x1] %v555_v32 }
 0x200 PF: > { %s15_s15 = sadd.s32 1, %s742_s15  }
 0x201   : > { %p12_p5 = scmp.ge.s32.totalorder %s15_s15, 4  }
 0x203   :  { %14 = sbr.rel (!%p12_p5) target bundleno = 1 (0x1), region = 85 }

</bundles_post_ra>
